<compile_context>
chip_gen: v7x
topology: tpu7x:2x2x1
jax: 0.10.0
libtpu: 0.0.40
codegen_flags: <defaults>
</compile_context>

<pallas_src>
import numpy as np
import jax
import jax.numpy as jnp
from jax.experimental import pallas as pl
from jax.experimental.pallas import tpu as pltpu


def build_cur(image_size: int, psize: int, stride: int):
    """Patch start positions along one axis (replicates image2patch.__init__)."""
    window_size = image_size + 1 - psize
    cur = np.arange(0, window_size, stride)
    if cur[-1] != window_size - 1:
        cur = np.concatenate([cur, np.array([window_size - 1])])
    return cur.astype(np.int32), window_size


def build_mask(image_size: int, psize: int, stride: int):
    """Full flattened mask, used only by the pure-JAX reference."""
    cur, ws = build_cur(image_size, psize, stride)
    mask = np.arange(ws * ws).reshape(ws, ws)
    mask = mask[cur, :][:, cur]
    return mask.reshape(-1).astype(np.int64), ws


def _make_im2col_kernel(psize: int, nc: int, stride: int, cur_host: np.ndarray):
    """Builds the copy kernel.

    Refs seen by the kernel:
      cur_ref : SMEM (nc,) int32    -- prefetched patch start offsets
      x_ref   : VMEM (bc_tile, H, W) float32 (full image tile, revisited)
      o_ref   : VMEM (bc_tile, psize^2, nc) float32 (leading patch-row dim squeezed)
                o_ref[bc, i*psize+j, b] = x[bc, cur[a]+i, cur[b]+j],
                a = pl.program_id(1) = patch-row handled by this grid step.
    """
    regular_cols = (stride == 1)  # then cur == arange(nc): contiguous columns

    def kernel(cur_ref, x_ref, o_ref):
        a = pl.program_id(1)
        r0 = cur_ref[a]                              # dynamic patch-row start (SMEM)
        win = x_ref[:, pl.ds(r0, psize), :]          # (bc_tile, psize, W)
        for i in range(psize):                       # static unroll, psize^2 stores
            for j in range(psize):
                q = i * psize + j
                if regular_cols:
                    # columns cur[b]+j == j .. j+nc-1 -> one contiguous lane slice
                    o_ref[:, q:q + 1, :] = win[:, i:i + 1, j:j + nc]
                else:
                    # Irregular column grid (stride > 1, possibly appended last
                    # column). cur is known at trace time -> static lane slices.
                    for b in range(nc):
                        cb = int(cur_host[b]) + j
                        o_ref[:, q:q + 1, b:b + 1] = win[:, i:i + 1, cb:cb + 1]

    return kernel


def image2patch_forward(x, image_size: int, psize: int, stride: int):
    B, C, H, W = x.shape
    assert H == image_size and W == image_size

    cur, ws = build_cur(image_size, psize, stride)
    nc = int(cur.shape[0])          # number of patch positions per axis
    P = nc * nc                     # total patches
    p2 = psize * psize
    BC = B * C

    # Tile the B*C axis (parallel grid axis); pick a divisor of BC.
    bc_tile = BC
    for cand in (32, 16, 8):
        if BC >= cand and BC % cand == 0:
            bc_tile = cand
            break

    x_flat = x.reshape(BC, H, W).astype(jnp.float32)
    cur_dev = jnp.asarray(cur, dtype=jnp.int32)

    kernel = _make_im2col_kernel(psize, nc, stride, cur)

    x_bytes = BC * H * W * 4
    out_bytes = nc * BC * p2 * nc * 4

    # Kernel output layout: (patch_row a, BC, psize^2, patch_col b)
    out4 = pl.pallas_call(
        kernel,
        out_shape=jax.ShapeDtypeStruct((nc, BC, p2, nc), jnp.float32),
        grid_spec=pltpu.PrefetchScalarGridSpec(
            num_scalar_prefetch=1,
            grid=(BC // bc_tile, nc),
            in_specs=[
                # Full spatial tile per B*C block; constant along the inner
                # (patch-row) axis -> fetched once per B*C tile.
                pl.BlockSpec((bc_tile, H, W), lambda bc, a, cur_ref: (bc, 0, 0)),
            ],
            out_specs=pl.BlockSpec(
                (None, bc_tile, p2, nc),            # leading patch-row dim squeezed
                lambda bc, a, cur_ref: (a, bc, 0, 0)),
        ),
        compiler_params=pltpu.CompilerParams(
            dimension_semantics=("parallel", "parallel")),
        cost_estimate=pl.CostEstimate(
            flops=0, transcendentals=0, bytes_accessed=x_bytes + out_bytes),
    )(cur_dev, x_flat)

    # Layout plumbing only: (a, bc, q, b) -> (bc, a*nc + b, q)
    out = jnp.transpose(out4, (1, 0, 3, 2)).reshape(BC, P, p2)
    return out


def reference_to_patch(x, image_size: int, psize: int, stride: int):
    """Pure-JAX reference mirroring to_patch() for correctness checking."""
    mask, ws = build_mask(image_size, psize, stride)
    B, C, H, W = x.shape
    xf = x.reshape(B * C, H, W).astype(jnp.float32)
    cols = []
    for i in range(psize):
        for j in range(psize):
            cols.append(xf[:, i:i + ws, j:j + ws].reshape(B * C, ws * ws))
    patch_set = jnp.stack(cols, axis=-1)  # (B*C, ws^2, psize^2)
    return patch_set[:, mask]


if __name__ == "__main__":
    # Small shapes consistent with the module: image_size=16, psize=2, stride=1
    B, C, image_size, psize, stride = 2, 4, 16, 2, 1
    key = jax.random.PRNGKey(0)
    x = jax.random.normal(key, (B, C, image_size, image_size), dtype=jnp.float32)

    out = image2patch_forward(x, image_size, psize, stride)
    out = jax.block_until_ready(out)

    ref = reference_to_patch(x, image_size, psize, stride)
    assert out.shape == ref.shape, (out.shape, ref.shape)
    np.testing.assert_allclose(np.asarray(out), np.asarray(ref), rtol=1e-6, atol=1e-6)

    print("KERNEL_OK")
</pallas_src>

<mosaic_0001>
module attributes {stable_mosaic.version = 11 : i64} {
  func.func @kernel(%arg0: i32, %arg1: i32, %arg2: memref<15xi32, #tpu.memory_space<smem>>, %arg3: memref<8x16x16xf32, #tpu.memory_space<vmem>>, %arg4: memref<1x8x4x15xf32, #tpu.memory_space<vmem>>) attributes {dimension_semantics = [#tpu.dimension_semantics<parallel>, #tpu.dimension_semantics<parallel>], iteration_bounds = array<i64: 1, 15>, scalar_prefetch = 1 : i64, scratch_operands = 0 : i64, tpu.core_type = #tpu.core_type<tc>, window_params = [{transform_indices = @transform_0, window_bounds = array<i64: 8, 16, 16>}, {transform_indices = @transform_1, window_bounds = array<i64: 1, 8, 4, 15>}]} {
    %0 = arith.index_cast %arg1 : i32 to index
    %1 = memref.load %arg2[%0] : memref<15xi32, #tpu.memory_space<smem>>
    %c0 = arith.constant 0 : index
    %2 = arith.index_cast %1 : i32 to index
    %c0_0 = arith.constant 0 : index
    %3 = vector.load %arg3[%c0, %2, %c0_0] : memref<8x16x16xf32, #tpu.memory_space<vmem>>, vector<8x2x16xf32>
    %4 = vector.extract_strided_slice %3 {offsets = [0, 0, 0], sizes = [8, 1, 15], strides = [1, 1, 1]} : vector<8x2x16xf32> to vector<8x1x15xf32>
    %c0_1 = arith.constant 0 : index
    %c0_2 = arith.constant 0 : index
    %c0_3 = arith.constant 0 : index
    %c0_4 = arith.constant 0 : index
    %5 = vector.load %arg4[%c0_1, %c0_2, %c0_3, %c0_4] : memref<1x8x4x15xf32, #tpu.memory_space<vmem>>, vector<1x8x1x15xf32>
    %6 = vector.shape_cast %5 : vector<1x8x1x15xf32> to vector<8x1x15xf32>
    %7 = vector.shape_cast %4 : vector<8x1x15xf32> to vector<1x8x1x15xf32>
    tpu.vector_store %arg4[%c0_1, %c0_2, %c0_3, %c0_4], %7 {strides = array<i32>} : memref<1x8x4x15xf32, #tpu.memory_space<vmem>>, vector<1x8x1x15xf32>,
    %8 = vector.extract_strided_slice %3 {offsets = [0, 0, 1], sizes = [8, 1, 15], strides = [1, 1, 1]} : vector<8x2x16xf32> to vector<8x1x15xf32>
    %c0_5 = arith.constant 0 : index
    %c0_6 = arith.constant 0 : index
    %c1 = arith.constant 1 : index
    %c0_7 = arith.constant 0 : index
    %9 = vector.load %arg4[%c0_5, %c0_6, %c1, %c0_7] : memref<1x8x4x15xf32, #tpu.memory_space<vmem>>, vector<1x8x1x15xf32>
    %10 = vector.shape_cast %9 : vector<1x8x1x15xf32> to vector<8x1x15xf32>
    %11 = vector.shape_cast %8 : vector<8x1x15xf32> to vector<1x8x1x15xf32>
    tpu.vector_store %arg4[%c0_5, %c0_6, %c1, %c0_7], %11 {strides = array<i32>} : memref<1x8x4x15xf32, #tpu.memory_space<vmem>>, vector<1x8x1x15xf32>,
    %12 = vector.extract_strided_slice %3 {offsets = [0, 1, 0], sizes = [8, 1, 15], strides = [1, 1, 1]} : vector<8x2x16xf32> to vector<8x1x15xf32>
    %c0_8 = arith.constant 0 : index
    %c0_9 = arith.constant 0 : index
    %c2 = arith.constant 2 : index
    %c0_10 = arith.constant 0 : index
    %13 = vector.load %arg4[%c0_8, %c0_9, %c2, %c0_10] : memref<1x8x4x15xf32, #tpu.memory_space<vmem>>, vector<1x8x1x15xf32>
    %14 = vector.shape_cast %13 : vector<1x8x1x15xf32> to vector<8x1x15xf32>
    %15 = vector.shape_cast %12 : vector<8x1x15xf32> to vector<1x8x1x15xf32>
    tpu.vector_store %arg4[%c0_8, %c0_9, %c2, %c0_10], %15 {strides = array<i32>} : memref<1x8x4x15xf32, #tpu.memory_space<vmem>>, vector<1x8x1x15xf32>,
    %16 = vector.extract_strided_slice %3 {offsets = [0, 1, 1], sizes = [8, 1, 15], strides = [1, 1, 1]} : vector<8x2x16xf32> to vector<8x1x15xf32>
    %c0_11 = arith.constant 0 : index
    %c0_12 = arith.constant 0 : index
    %c3 = arith.constant 3 : index
    %c0_13 = arith.constant 0 : index
    %17 = vector.load %arg4[%c0_11, %c0_12, %c3, %c0_13] : memref<1x8x4x15xf32, #tpu.memory_space<vmem>>, vector<1x8x1x15xf32>
    %18 = vector.shape_cast %17 : vector<1x8x1x15xf32> to vector<8x1x15xf32>
    %19 = vector.shape_cast %16 : vector<8x1x15xf32> to vector<1x8x1x15xf32>
    tpu.vector_store %arg4[%c0_11, %c0_12, %c3, %c0_13], %19 {strides = array<i32>} : memref<1x8x4x15xf32, #tpu.memory_space<vmem>>, vector<1x8x1x15xf32>,
    return
  }
  func.func @transform_0(%arg0: i32, %arg1: i32, %arg2: memref<15xi32, #tpu.memory_space<smem>>) -> (i32, i32, i32) {
    %c0_i32 = arith.constant 0 : i32
    %c0_i32_0 = arith.constant 0 : i32
    %c0_i32_1 = arith.constant 0 : i32
    return %arg0, %c0_i32, %c0_i32_0 : i32, i32, i32
  }
  func.func @transform_1(%arg0: i32, %arg1: i32, %arg2: memref<15xi32, #tpu.memory_space<smem>>) -> (i32, i32, i32, i32) {
    %c0_i32 = arith.constant 0 : i32
    %c0_i32_0 = arith.constant 0 : i32
    %c0_i32_1 = arith.constant 0 : i32
    return %arg1, %arg0, %c0_i32, %c0_i32_0 : i32, i32, i32, i32
  }
}

</mosaic_0001>

<bundles_post_ra>
// kernel: tpu_custom_call.1
= control target key start
LH: loop header
LB: loop body
LE: loop exit
PB: predicated region body
PF: predicated region fallthrough
CT: control target
= control target key end

     0   :  { %s772_s0 = inlined_call_operand.hbm [shape: s32[15], index: 0, kind: input, shape index: {}]   ;;  %s773_s1 = inlined_call_operand.hbm [shape: f32[8,16,16], index: 1, kind: input, shape index: {}]   ;;  %s774_s2 = inlined_call_operand.hbm [shape: f32[15,8,4,15], index: 2, kind: output, shape index: {}]  }
   0x1   :  { %s393_s11 = scalar_lea.hbm %s772_s0, 16 }
   0x2   :  { %p394_p0 = scmp.ne.s32.totalorder %s772_s0, %s393_s11  ;;  %p397_p1 = scmp.lt.u32.totalorder %s393_s11, %s772_s0 }
   0x4   :  { %p399_p2 = pnand %p397_p1, %p394_p0 }
   0x6   :  { %402 = shalt.err (!%p399_p2)  }
   0x7   :  { %s517_s16 = smov [#allocation3]  }
   0x8   :  { %8 = dma.hbm_to_smem %s772_s0, 16, %s517_s16, [#allocation2] }
   0x9   :  { %483 = dma.done.wait [#allocation2], 16 }
   0xa   :  { %484 = vsyncadd [#allocation2], 4294967280 }
   0xb   :  { %10 = sfence }
   0xc   :  { %11 = vsyncpa [#allocation5], 0 }
   0xd   :  { %12 = vsyncpa [#allocation6], 0 }
   0xe   :  { %14 = vsyncpa [#allocation6 + $0x1], 0  ;;  %s552_s19 = smov 0   ;;  %s554_s20 = smov 0  }
   0xf   :  { %s556_s21 = smov 0   ;;  %s558_s22 = smov 0  }
  0x10   :  { %s560_s23 = smov 0   ;;  %s562_s24 = smov 0  }
  0x11 LB: > { %s308_s0 = sadd.s32 4294967295, %s515_s24   ;;  %s309_s25 = sadd.s32 4294967294, %s515_s24   ;;  %s515_s24 = sphi %s562_s24, %s20_s24   ;;  %s511_s23 = sphi %s560_s23, %s792_s23   ;;  %s507_s22 = sphi %s558_s22, %s791_s22   ;;  %s503_s21 = sphi %s556_s21, %s790_s21   ;;  %s499_s20 = sphi %s554_s20, %s789_s20   ;;  %s495_s19 = sphi %s552_s19, %s788_s19  }
  0x12   : > { %s29_s26 = sadd.s32 1, %s511_s23  ;;  %s67_s27 = sadd.s32 1, %s503_s21 }
  0x13   : > { %p30_p3 = scmp.ge.s32.totalorder %s29_s26, 15  ;;  %p77_p4 = scmp.ne.s32.totalorder %s503_s21, %s499_s20 }
  0x14   : > { %p78_p5 = scmp.eq.s32.totalorder %s308_s0, 14  ;;  %p83_p6 = scmp.ne.s32.totalorder %s499_s20, %s495_s19 }
  0x15   : > { %s794_s26 = smov (%p30_p3, %s29_s26), 0  ;;  %p84_p8 = scmp.eq.s32.totalorder %s309_s25, 14 }
  0x16   : > { %p592_p7 = por %p78_p5, %p77_p4  ;;  %s62_s29 = ssub.s32 %s511_s23, %s794_s26 }
  0x17   : > { %p310_p9 = scmp.ge.s32.totalorder %s515_s24, 1  ;;  %p65_p10 = scmp.eq.s32.totalorder %s62_s29, 0 }
  0x18   : > { %s779_s28 = scalar_select %p592_p7, 1, 0 }
  0x19   : > { %p599_p11 = por %p84_p8, %p83_p6  ;;  %p91_p12 = scmp.lt.s32.totalorder %s515_s24, 16 }
  0x1a   : > { %s605_s3 = scalar_select %p65_p10, %s503_s21, %s67_s27  }
  0x1b   : > { %s780_s30 = scalar_select %p599_p11, 1, 0 }
  0x1c   : > { %p607_p13 = pnand %p310_p9, %p91_p12  ;;  %p611_p0 = scmp.eq.s32.totalorder %s308_s0, 0 }
  0x1d   : > { %s518_s6 = smov [#allocation4]   ;;  %s403_s11 = scalar_lea.hbm %s773_s1, 2048 }
  0x1e   : > { %s781_s4 = scalar_select %p607_p13, 1, 0 }
  0x1f   : > { %s782_s5 = scalar_select %p611_p0, 1, 0 }
  0x20   : > { %p327_p1 = pneg %p607_p13  ;;  %s107_s7 = sshll.u32 %s518_s6, 4  ;;  %s108_s7 = int_to_ptr.vmem [resolvable:$true] %s107_s7 }
  0x21   : > { %p404_p3 = scmp.ne.s32.totalorder %s773_s1, %s403_s11  ;;  %p410_p8 = scmp.lt.u32.totalorder %s403_s11, %s773_s1 }
  0x22   : > { %p619_p2 = pnand %p611_p0, %p327_p1 }
  0x24   : > { %p405_p4 = pneg %p619_p2 }
  0x26   : > { %p406_p5 = pnand %p405_p4, %p404_p3 }
  0x28   : > { %p407_p6 = pneg %p406_p5 }
  0x2a   : > { %p412_p9 = pnand %p410_p8, %p407_p6 }
  0x2c   : > { %415 = shalt.err (!%p412_p9)
}
  0x2d   : > { %s416_s16 = scalar_lea.vmem %s108_s7, 2048  ;;  %p424_p11 = scmp.lt.s32.totalorder %s108_s7, %s108_s7 }
  0x2e   : > { %p417_p10 = scmp.ne.s32.totalorder %s108_s7, %s416_s16  ;;  %p425_p7 = scmp.lt.s32.totalorder %s416_s16, %s416_s16 }
  0x30   : > { %p419_p12 = pnand %p417_p10, %p405_p4  ;;  %p426_p0 = por %p425_p7, %p424_p11 }
  0x32   : > { %p420_p1 = pneg %p419_p12 }
  0x34   : > { %p427_p13 = pnand %p426_p0, %p420_p1 }
  0x36   : > { %430 = shalt.err (!%p427_p13)
}
  0x37   : > { %s519_s17 = smov 128   ;;  %s520_s18 = smov 8  }
  0x38   : > { %330 = dma.hbm_to_vmem [thread:$0]  (!%p619_p2), %s773_s1, 2048, %s108_s7, [#allocation5], %s519_s17, %s519_s17, %s520_s18  }
  0x39   : > { %p784_p3 = scmp.ne.s32.totalorder %s781_s4, 0 }
  0x3a   : > { %p785_p5 = scmp.ne.s32.totalorder (!%p784_p3), %s782_s5, 0 }
  0x3b   : > { %123 = sbr.rel (%p784_p3) target bundleno = 219 (0xdb), region = 24 }
  0x42   : > { %486 = dma.done.wait (%p785_p5), [#allocation5], 2048  }
  0x43   : > { %488 = vsyncadd (%p785_p5), [#allocation5], 4294965248  ;;  %s135_s27 = sand.u32 1, %s499_s20   ;;  %s140_s29 = sld [smem:[#allocation3 + %s507_s22]]  ;;  %vm150_vm0 = vcmask 114688   ;;  %vm199_vm1 = vcmask 115713  }
  0x44   : > { %s314_s6 = sshll.u32 %s135_s27, 5  ;;  %s521_s4 = smov 127  }
  0x45   : > { %s649_s7 = scalar_lea.vmem [#allocation7], %s314_s6  ;;  %s320_s5 = sshll.u32 %s507_s22, 9 }
  0x46   : > { %s232_s9 = sshll.u32 %s649_s7, 4  ;;  %s712_s12 = scalar_lea.hbm %s774_s2, %s320_s5  ;;  %s714_s9 = int_to_ptr.vmem [resolvable:$true] %s232_s9 }
  0x47   : > { %s726_s22 = scalar_lea.sflag [#allocation6], %s135_s27  ;;  %s431_s13 = scalar_lea.vmem %s714_s9, 512 }
  0x48   : > { %p432_p7 = scmp.ne.s32.totalorder %s714_s9, %s431_s13  ;;  %p786_p11 = scmp.ne.s32.totalorder %s779_s28, 0 }
  0x49   : > { %s141_s8 = scalar_lea.vmem [#allocation4], %s140_s29  ;;  %s522_s14 = smov [#allocation7]  }
  0x4a   : > { %v144_v0 = vld [vmem:[%s141_s8 + $0x20] sm:$0x3]  ;;  %v145_v2 = vld [vmem:[%s141_s8 + $0x30] sm:$0x3]  ;;  %p433_p13 = pnand %p432_p7, %p786_p11  ;;  %s435_s15 = sshll.u32 %s522_s14, 4  ;;  %s436_s15 = int_to_ptr.vmem [resolvable:$false] %s435_s15 }
  0x4b   : > { %v142_v1 = vld [vmem:[%s141_s8] sm:$0x3]  ;;  %171 = vrot.lane.b32.xlu1 %v144_v0, %s521_s4  ;;  %153 = vst.msk [vmem:[%s649_s7 + $0x8] sm:$0x1] %vm150_vm0, %v144_v0  ;;  %154 = vst.msk [vmem:[%s649_s7 + $0xc] sm:$0x1] %vm150_vm0, %v145_v2  ;;  %p438_p2 = scmp.lt.s32.totalorder %s714_s9, %s436_s15 }
  0x4c   : > { %202 = vst.msk [vmem:[%s649_s7 + $0x9] sm:$0x2] %vm199_vm1, %v144_v0  ;;  %167 = vrot.lane.b32.xlu0 %v142_v1, %s521_s4  ;;  %200 = vst.msk [vmem:[%s649_s7 + $0x1] sm:$0x2] %vm199_vm1, %v142_v1  ;;  %v143_v3 = vld [vmem:[%s141_s8 + $0x10] sm:$0x3]  ;;  %p434_p0 = pneg %p433_p13 }
  0x4d   : > { %151 = vst.msk [vmem:[%s649_s7] sm:$0x1] %vm150_vm0, %v142_v1  ;;  %v147_v4 = vld [vmem:[%s141_s8 + $0x50] sm:$0x3]  ;;  %152 = vst.msk [vmem:[%s649_s7 + $0x4] sm:$0x1] %vm150_vm0, %v143_v3 }
  0x4e   : > { %203 = vst.msk [vmem:[%s649_s7 + $0xd] sm:$0x2] %vm199_vm1, %v145_v2  ;;  %201 = vst.msk [vmem:[%s649_s7 + $0x5] sm:$0x2] %vm199_vm1, %v143_v3  ;;  %v146_v5 = vld [vmem:[%s141_s8 + $0x40] sm:$0x3] }
  0x4f   : > { %156 = vst.msk [vmem:[%s649_s7 + $0x14] sm:$0x1] %vm150_vm0, %v147_v4  ;;  %v149_v6 = vld [vmem:[%s141_s8 + $0x70] sm:$0x3]  ;;  %v148_v7 = vld [vmem:[%s141_s8 + $0x60] sm:$0x3]  ;;  %173 = vrot.lane.b32.xlu1 %v145_v2, %s521_s4 }
  0x50   : > { %205 = vst.msk [vmem:[%s649_s7 + $0x15] sm:$0x2] %vm199_vm1, %v147_v4  ;;  %204 = vst.msk [vmem:[%s649_s7 + $0x11] sm:$0x2] %vm199_vm1, %v146_v5  ;;  %169 = vrot.lane.b32.xlu0 %v143_v3, %s521_s4  ;;  %s437_s16 = scalar_lea.vmem %s436_s15, 1024 }
  0x51   : > { %155 = vst.msk [vmem:[%s649_s7 + $0x10] sm:$0x1] %vm150_vm0, %v146_v5  ;;  %158 = vst.msk [vmem:[%s649_s7 + $0x1c] sm:$0x1] %vm150_vm0, %v149_v6  ;;  %p439_p4 = scmp.lt.s32.totalorder %s437_s16, %s431_s13 }
  0x52   : > { %207 = vst.msk [vmem:[%s649_s7 + $0x1d] sm:$0x2] %vm199_vm1, %v149_v6  ;;  %206 = vst.msk [vmem:[%s649_s7 + $0x19] sm:$0x2] %vm199_vm1, %v148_v7 }
  0x53   : > { %157 = vst.msk [vmem:[%s649_s7 + $0x18] sm:$0x1] %vm150_vm0, %v148_v7  ;;  %177 = vrot.lane.b32.xlu1 %v147_v4, %s521_s4  ;;  %p440_p6 = por %p439_p4, %p438_p2 }
  0x54   : > { %175 = vrot.lane.b32.xlu0 %v146_v5, %s521_s4 }
  0x55   : > { %p441_p8 = pnand %p440_p6, %p434_p0 }
  0x57   : > { %181 = vrot.lane.b32.xlu1 %v149_v6, %s521_s4 }
  0x58   : > { %179 = vrot.lane.b32.xlu0 %v148_v7, %s521_s4 }
  0xbd   : > { %v172_v8 = vpop.permute.xlu1 %171 }
  0xbe   : > { %v168_v9 = vpop.permute.xlu0 %167  ;;  %193 = vst.msk [vmem:[%s649_s7 + $0x9] sm:$0x1] %vm150_vm0, %v172_v8 }
  0xbf   : > { %210 = vst.msk [vmem:[%s649_s7 + $0xa] sm:$0x2] %vm199_vm1, %v172_v8  ;;  %208 = vst.msk [vmem:[%s649_s7 + $0x2] sm:$0x2] %vm199_vm1, %v168_v9 }
  0xc0   : > { %191 = vst.msk [vmem:[%s649_s7 + $0x1] sm:$0x1] %vm150_vm0, %v168_v9 }
  0xc1   : > { %v174_v10 = vpop.permute.xlu1 %173 }
  0xc2   : > { %v170_v11 = vpop.permute.xlu0 %169  ;;  %194 = vst.msk [vmem:[%s649_s7 + $0xd] sm:$0x1] %vm150_vm0, %v174_v10 }
  0xc3   : > { %211 = vst.msk [vmem:[%s649_s7 + $0xe] sm:$0x2] %vm199_vm1, %v174_v10  ;;  %209 = vst.msk [vmem:[%s649_s7 + $0x6] sm:$0x2] %vm199_vm1, %v170_v11 }
  0xc4   : > { %192 = vst.msk [vmem:[%s649_s7 + $0x5] sm:$0x1] %vm150_vm0, %v170_v11 }
  0xc5   : > { %v178_v12 = vpop.permute.xlu1 %177 }
  0xc6   : > { %v176_v13 = vpop.permute.xlu0 %175  ;;  %196 = vst.msk [vmem:[%s649_s7 + $0x15] sm:$0x1] %vm150_vm0, %v178_v12 }
  0xc7   : > { %213 = vst.msk [vmem:[%s649_s7 + $0x16] sm:$0x2] %vm199_vm1, %v178_v12  ;;  %212 = vst.msk [vmem:[%s649_s7 + $0x12] sm:$0x2] %vm199_vm1, %v176_v13 }
  0xc8   : > { %195 = vst.msk [vmem:[%s649_s7 + $0x11] sm:$0x1] %vm150_vm0, %v176_v13 }
  0xc9   : > { %v182_v14 = vpop.permute.xlu1 %181 }
  0xca   : > { %v180_v15 = vpop.permute.xlu0 %179  ;;  %198 = vst.msk [vmem:[%s649_s7 + $0x1d] sm:$0x1] %vm150_vm0, %v182_v14 }
  0xcb   : > { %215 = vst.msk [vmem:[%s649_s7 + $0x1e] sm:$0x2] %vm199_vm1, %v182_v14  ;;  %214 = vst.msk [vmem:[%s649_s7 + $0x1a] sm:$0x2] %vm199_vm1, %v180_v15 }
  0xcc   : > { %197 = vst.msk [vmem:[%s649_s7 + $0x19] sm:$0x1] %vm150_vm0, %v180_v15 }
  0xcd   : > { %444 = shalt.err (!%p441_p8)
}
  0xce   : > { %s445_s17 = scalar_lea.hbm %s712_s12, 512  ;;  %s449_s25 = scalar_lea.hbm %s774_s2, 7680 }
  0xcf   : > { %p446_p9 = scmp.ne.s32.totalorder %s712_s12, %s445_s17  ;;  %p450_p1 = scmp.lt.u32.totalorder %s712_s12, %s774_s2 }
  0xd0   : > { %p451_p3 = scmp.lt.u32.totalorder %s449_s25, %s445_s17  ;;  %p453_p7 = scmp.lt.u32.totalorder %s445_s17, %s712_s12 }
  0xd1   : > { %p447_p10 = pnand %p446_p9, %p786_p11 }
  0xd2   : > { %p452_p5 = por %p451_p3, %p450_p1 }
  0xd3   : > { %p448_p12 = pneg %p447_p10 }
  0xd4   : > { %p454_p13 = por %p453_p7, %p452_p5 }
  0xd6   : > { %p455_p0 = pnand %p454_p13, %p448_p12 }
  0xd8   : > { %458 = shalt.err (!%p455_p0)
}
  0xd9   : > { %s523_s6 = smov 64   ;;  %s524_s8 = smov 4  }
  0xda   : > { %325 = dma.vmem_to_hbm [thread:$0]  (%p786_p11), %s714_s9, 512, %s712_s12, %s726_s22, %s523_s6, %s523_s6, %s524_s8  }
  0xdb PF: > { %p337_p2 = scmp.ge.s32.totalorder %s515_s24, 2  ;;  %s247_s4 = sand.u32 1, %s495_s19  }
  0xdc   : > { %p787_p4 = scmp.ne.s32.totalorder %s780_s30, 0  ;;  %s248_s7 = scalar_lea.sflag [#allocation6], %s247_s4 }
  0xde   : > { %p332_p6 = pnand %p337_p2, %p787_p4 }
  0xe0   : > { %490 = dma.done.wait (!%p332_p6), %s248_s7, 512  }
  0xe1   : > { %492 = vsyncadd (!%p332_p6), %s248_s7, 4294966784  ;;  %s20_s24 = sadd.s32 1, %s515_s24   ;;  %s788_s19 = smov %s499_s20 }
  0xe2   : > { %p17_p8 = scmp.ge.s32.totalorder %s20_s24, 17   ;;  %s789_s20 = smov %s503_s21 }
  0xe3   : > { %s790_s21 = smov %s605_s3  ;;  %s791_s22 = smov %s511_s23 }
  0xe4   : > { %s792_s23 = smov %s794_s26  ;;  %19 = sbr.rel (!%p17_p8) target bundleno = 17 (0x11), region = 63 }
  0xeb   :  { %253 = vsyncpa [#allocation5], 1 }
  0xec   :  { %255 = vsyncpa [#allocation5 + $0x1], 1 }
  0xed   :  { %256 = vsyncpa [#allocation6], 1 }
  0xee   :  { %258 = vsyncpa [#allocation6 + $0x1], 1 }

</bundles_post_ra>
